<compile_context>
chip_gen: v6e
topology: v6e:2x2x1
jax: 0.10.0
libtpu: 0.0.40
codegen_flags: <defaults>
</compile_context>

<pallas_src>
import functools

import jax
import jax.numpy as jnp
from jax.experimental import pallas as pl
from jax.experimental.pallas import tpu as pltpu

_LANE = 128     # lane width: last dims padded to a multiple of this
_SUBLANE = 8    # f32 sublane tile


def _round_up(n, m):
    return ((n + m - 1) // m) * m


def _vae_kernel(x_ref, we_ref, be_ref, wd_ref, bd_ref, recon_ref, z_ref):
    # Encoder: z = x @ We_t + be   (f32 accumulate on the MXU)
    x = x_ref[...]
    z_acc = jnp.dot(x, we_ref[...], preferred_element_type=jnp.float32)
    z_acc = z_acc + be_ref[...]                 # (1, Lp) broadcasts over batch tile
    z_out = z_acc.astype(z_ref.dtype)
    z_ref[...] = z_out

    # Decoder consumes the *returned* (rounded) z so recon == decoder(z) exactly.
    recon = jnp.dot(z_out, wd_ref[...], preferred_element_type=jnp.float32)
    recon = recon + bd_ref[...]                 # (1, Dp) broadcasts over batch tile
    recon_ref[...] = recon.astype(recon_ref.dtype)


def prepare_vae_params(w_enc, b_enc, w_dec, b_dec):
    """One-time parameter prep: transpose to (in, out) and zero-pad feature dims
    to multiples of 128 lanes. Do this once (not per forward call)."""
    latent_dim, input_dim = w_enc.shape
    d_pad = _round_up(input_dim, _LANE)
    l_pad = _round_up(latent_dim, _LANE)

    we_t = jnp.zeros((d_pad, l_pad), w_enc.dtype).at[:input_dim, :latent_dim].set(w_enc.T)
    wd_t = jnp.zeros((l_pad, d_pad), w_dec.dtype).at[:latent_dim, :input_dim].set(w_dec.T)
    be = jnp.zeros((1, l_pad), b_enc.dtype).at[0, :latent_dim].set(b_enc)
    bd = jnp.zeros((1, d_pad), b_dec.dtype).at[0, :input_dim].set(b_dec)
    return {"we_t": we_t, "be": be, "wd_t": wd_t, "bd": bd,
            "input_dim": input_dim, "latent_dim": latent_dim}


@functools.partial(jax.jit, static_argnames=("input_dim", "latent_dim"))
def _vae_forward_padded(x, we_t, be, wd_t, bd, *, input_dim, latent_dim):
    B = x.shape[0]
    d_pad = we_t.shape[0]
    l_pad = we_t.shape[1]

    # Batch tile: big enough for pipelining on real batches, sublane-aligned.
    TB = min(512, _round_up(B, _SUBLANE))
    B_pad = _round_up(B, TB)

    # Pad activations (no-op slices when already aligned).
    x_p = x
    if B_pad != B or d_pad != input_dim:
        x_p = jnp.zeros((B_pad, d_pad), x.dtype).at[:B, :input_dim].set(x)

    grid = (pl.cdiv(B_pad, TB),)

    # VMEM budget (bytes): double-buffered activation tiles + resident weights.
    itemsize = 4
    act_bytes = 2 * (TB * d_pad + TB * d_pad + TB * l_pad) * itemsize
    w_bytes = 2 * (d_pad * l_pad * 2 + d_pad + l_pad) * itemsize
    est_vmem = act_bytes + w_bytes
    cp_kwargs = dict(dimension_semantics=("parallel",))
    if est_vmem > 30 * (1 << 20):  # only raise above the default scoped limit
        cp_kwargs["vmem_limit_bytes"] = int(est_vmem * 1.25)

    cost = pl.CostEstimate(
        flops=2 * B_pad * d_pad * l_pad * 2,     # two matmuls
        transcendentals=0,
        bytes_accessed=(B_pad * d_pad * 2 + B_pad * l_pad
                        + 2 * d_pad * l_pad + d_pad + l_pad) * itemsize,
    )

    recon_p, z_p = pl.pallas_call(
        _vae_kernel,
        out_shape=(
            jax.ShapeDtypeStruct((B_pad, d_pad), x.dtype),
            jax.ShapeDtypeStruct((B_pad, l_pad), x.dtype),
        ),
        grid=grid,
        in_specs=[
            pl.BlockSpec((TB, d_pad), lambda i: (i, 0)),        # x tile (pipelined)
            pl.BlockSpec((d_pad, l_pad), lambda i: (0, 0)),     # We^T (resident)
            pl.BlockSpec((1, l_pad), lambda i: (0, 0)),         # be   (resident)
            pl.BlockSpec((l_pad, d_pad), lambda i: (0, 0)),     # Wd^T (resident)
            pl.BlockSpec((1, d_pad), lambda i: (0, 0)),         # bd   (resident)
        ],
        out_specs=(
            pl.BlockSpec((TB, d_pad), lambda i: (i, 0)),        # recon tile
            pl.BlockSpec((TB, l_pad), lambda i: (i, 0)),        # z tile
        ),
        compiler_params=pltpu.CompilerParams(**cp_kwargs),
        cost_estimate=cost,
    )(x_p, we_t, be, wd_t, bd)

    return recon_p[:B, :input_dim], z_p[:B, :latent_dim]


def confounder_vae_forward(x, params):
    """x: (B, input_dim); params: output of prepare_vae_params (prepared once).

    Returns (recon_x, z) matching the PyTorch forward semantics.
    """
    return _vae_forward_padded(
        x, params["we_t"], params["be"], params["wd_t"], params["bd"],
        input_dim=params["input_dim"], latent_dim=params["latent_dim"])


if __name__ == "__main__":
    # Small shapes consistent with the module: batch=8, input_dim=32, latent_dim=16.
    B, INPUT_DIM, LATENT_DIM = 8, 32, 16

    key = jax.random.PRNGKey(0)
    k_x, k_we, k_be, k_wd, k_bd = jax.random.split(key, 5)

    x = jax.random.normal(k_x, (B, INPUT_DIM), dtype=jnp.float32)

    # Deterministic parameter init (mimic nn.Linear's uniform(-1/sqrt(in), 1/sqrt(in))).
    enc_bound = 1.0 / jnp.sqrt(jnp.float32(INPUT_DIM))
    dec_bound = 1.0 / jnp.sqrt(jnp.float32(LATENT_DIM))
    w_enc = jax.random.uniform(k_we, (LATENT_DIM, INPUT_DIM), jnp.float32,
                               -enc_bound, enc_bound)
    b_enc = jax.random.uniform(k_be, (LATENT_DIM,), jnp.float32,
                               -enc_bound, enc_bound)
    w_dec = jax.random.uniform(k_wd, (INPUT_DIM, LATENT_DIM), jnp.float32,
                               -dec_bound, dec_bound)
    b_dec = jax.random.uniform(k_bd, (INPUT_DIM,), jnp.float32,
                               -dec_bound, dec_bound)

    # One-time parameter preparation (transpose + lane padding hoisted out of forward).
    params = prepare_vae_params(w_enc, b_enc, w_dec, b_dec)

    recon_x, z = confounder_vae_forward(x, params)
    jax.block_until_ready((recon_x, z))

    # Reference check against plain JAX.
    z_ref = x @ w_enc.T + b_enc
    recon_ref = z_ref @ w_dec.T + b_dec
    assert recon_x.shape == (B, INPUT_DIM) and z.shape == (B, LATENT_DIM)
    assert jnp.allclose(z, z_ref, atol=1e-5, rtol=1e-5)
    assert jnp.allclose(recon_x, recon_ref, atol=1e-5, rtol=1e-5)

    print("KERNEL_OK")
</pallas_src>

<mosaic_0001>
module attributes {stable_mosaic.version = 11 : i64} {
  func.func @_vae_kernel(%arg0: i32, %arg1: memref<8x128xf32, #tpu.memory_space<vmem>>, %arg2: memref<128x128xf32, #tpu.memory_space<vmem>>, %arg3: memref<1x128xf32, #tpu.memory_space<vmem>>, %arg4: memref<128x128xf32, #tpu.memory_space<vmem>>, %arg5: memref<1x128xf32, #tpu.memory_space<vmem>>, %arg6: memref<8x128xf32, #tpu.memory_space<vmem>>, %arg7: memref<8x128xf32, #tpu.memory_space<vmem>>) attributes {dimension_semantics = [#tpu.dimension_semantics<parallel>], iteration_bounds = array<i64: 1>, scalar_prefetch = 0 : i64, scratch_operands = 0 : i64, tpu.core_type = #tpu.core_type<tc>, window_params = [{transform_indices = @transform_0, window_bounds = array<i64: 8, 128>}, {pipeline_mode = #tpu.pipeline_mode<synchronous>, transform_indices = @transform_1, window_bounds = array<i64: 128, 128>}, {pipeline_mode = #tpu.pipeline_mode<synchronous>, transform_indices = @transform_2, window_bounds = array<i64: 1, 128>}, {pipeline_mode = #tpu.pipeline_mode<synchronous>, transform_indices = @transform_3, window_bounds = array<i64: 128, 128>}, {pipeline_mode = #tpu.pipeline_mode<synchronous>, transform_indices = @transform_4, window_bounds = array<i64: 1, 128>}, {transform_indices = @transform_5, window_bounds = array<i64: 8, 128>}, {transform_indices = @transform_6, window_bounds = array<i64: 8, 128>}]} {
    %c0 = arith.constant 0 : index
    %c0_0 = arith.constant 0 : index
    %0 = vector.load %arg1[%c0, %c0_0] : memref<8x128xf32, #tpu.memory_space<vmem>>, vector<8x128xf32>
    %c0_1 = arith.constant 0 : index
    %c0_2 = arith.constant 0 : index
    %1 = vector.load %arg2[%c0_1, %c0_2] : memref<128x128xf32, #tpu.memory_space<vmem>>, vector<128x128xf32>
    %cst = arith.constant dense<0.000000e+00> : vector<8x128xf32>
    %2 = tpu.matmul %0, %1, %cst {dimension_numbers = #tpu.dot_dimension_numbers<[1], [0], [0], [1], [0, 0, 1, 1], [], []>} : vector<8x128xf32>, vector<128x128xf32>, vector<8x128xf32> -> vector<8x128xf32>
    %c0_3 = arith.constant 0 : index
    %c0_4 = arith.constant 0 : index
    %3 = vector.load %arg3[%c0_3, %c0_4] : memref<1x128xf32, #tpu.memory_space<vmem>>, vector<1x128xf32>
    %4 = vector.broadcast %3 : vector<1x128xf32> to vector<8x128xf32>
    %5 = arith.addf %2, %4 : vector<8x128xf32>
    %c0_5 = arith.constant 0 : index
    %c0_6 = arith.constant 0 : index
    %6 = vector.load %arg7[%c0_5, %c0_6] : memref<8x128xf32, #tpu.memory_space<vmem>>, vector<8x128xf32>
    tpu.vector_store %arg7[%c0_5, %c0_6], %5 {strides = array<i32>} : memref<8x128xf32, #tpu.memory_space<vmem>>, vector<8x128xf32>,
    %c0_7 = arith.constant 0 : index
    %c0_8 = arith.constant 0 : index
    %7 = vector.load %arg4[%c0_7, %c0_8] : memref<128x128xf32, #tpu.memory_space<vmem>>, vector<128x128xf32>
    %cst_9 = arith.constant dense<0.000000e+00> : vector<8x128xf32>
    %8 = tpu.matmul %5, %7, %cst_9 {dimension_numbers = #tpu.dot_dimension_numbers<[1], [0], [0], [1], [0, 0, 1, 1], [], []>} : vector<8x128xf32>, vector<128x128xf32>, vector<8x128xf32> -> vector<8x128xf32>
    %c0_10 = arith.constant 0 : index
    %c0_11 = arith.constant 0 : index
    %9 = vector.load %arg5[%c0_10, %c0_11] : memref<1x128xf32, #tpu.memory_space<vmem>>, vector<1x128xf32>
    %10 = vector.broadcast %9 : vector<1x128xf32> to vector<8x128xf32>
    %11 = arith.addf %8, %10 : vector<8x128xf32>
    %c0_12 = arith.constant 0 : index
    %c0_13 = arith.constant 0 : index
    %12 = vector.load %arg6[%c0_12, %c0_13] : memref<8x128xf32, #tpu.memory_space<vmem>>, vector<8x128xf32>
    tpu.vector_store %arg6[%c0_12, %c0_13], %11 {strides = array<i32>} : memref<8x128xf32, #tpu.memory_space<vmem>>, vector<8x128xf32>,
    return
  }
  func.func @transform_0(%arg0: i32) -> (i32, i32) {
    %c0_i32 = arith.constant 0 : i32
    %c0_i32_0 = arith.constant 0 : i32
    return %arg0, %c0_i32 : i32, i32
  }
  func.func @transform_1(%arg0: i32) -> (i32, i32) {
    %c0_i32 = arith.constant 0 : i32
    %c0_i32_0 = arith.constant 0 : i32
    %c0_i32_1 = arith.constant 0 : i32
    return %c0_i32, %c0_i32_0 : i32, i32
  }
  func.func @transform_2(%arg0: i32) -> (i32, i32) {
    %c0_i32 = arith.constant 0 : i32
    %c0_i32_0 = arith.constant 0 : i32
    %c0_i32_1 = arith.constant 0 : i32
    return %c0_i32, %c0_i32_0 : i32, i32
  }
  func.func @transform_3(%arg0: i32) -> (i32, i32) {
    %c0_i32 = arith.constant 0 : i32
    %c0_i32_0 = arith.constant 0 : i32
    %c0_i32_1 = arith.constant 0 : i32
    return %c0_i32, %c0_i32_0 : i32, i32
  }
  func.func @transform_4(%arg0: i32) -> (i32, i32) {
    %c0_i32 = arith.constant 0 : i32
    %c0_i32_0 = arith.constant 0 : i32
    %c0_i32_1 = arith.constant 0 : i32
    return %c0_i32, %c0_i32_0 : i32, i32
  }
  func.func @transform_5(%arg0: i32) -> (i32, i32) {
    %c0_i32 = arith.constant 0 : i32
    %c0_i32_0 = arith.constant 0 : i32
    return %arg0, %c0_i32 : i32, i32
  }
  func.func @transform_6(%arg0: i32) -> (i32, i32) {
    %c0_i32 = arith.constant 0 : i32
    %c0_i32_0 = arith.constant 0 : i32
    return %arg0, %c0_i32 : i32, i32
  }
}

</mosaic_0001>

<bundles_post_ra>
// kernel: _vae_forward_padded.1
= control target key start
LH: loop header
LB: loop body
LE: loop exit
PB: predicated region body
PF: predicated region fallthrough
CT: control target
= control target key end

     0   :  { %12 = vsyncpa [#allocation3], 0  ;;  %s571_s0 = inlined_call_operand.vmem [shape: f32[8,128], index: 0, kind: input, shape index: {}]   ;;  %s572_s1 = inlined_call_operand.hbm [shape: f32[128,128], index: 1, kind: input, shape index: {}]   ;;  %s573_s2 = inlined_call_operand.vmem [shape: f32[1,128], index: 2, kind: input, shape index: {}]   ;;  %s574_s3 = inlined_call_operand.hbm [shape: f32[128,128], index: 3, kind: input, shape index: {}]   ;;  %s575_s4 = inlined_call_operand.vmem [shape: f32[1,128], index: 4, kind: input, shape index: {}]   ;;  %s576_s5 = inlined_call_operand.hbm [shape: f32[8,128], index: 5, kind: output, shape index: {0}]   ;;  %s577_s6 = inlined_call_operand.hbm [shape: f32[8,128], index: 6, kind: output, shape index: {1}]  }
   0x1   :  { %13 = vsyncpa [#allocation6], 0 }
   0x2   :  { %14 = vsyncpa [#allocation4], 0 }
   0x3   :  { %15 = vsyncpa [#allocation9], 0  ;;  %s473_s21 = smov [#allocation2]  }
   0x4   :  { %s23_s22 = sshll.u32 %s473_s21, 4  ;;  %s24_s22 = int_to_ptr.vmem [resolvable:$true] %s23_s22 }
   0x5   :  { %s393_s23 = scalar_lea.vmem %s24_s22, 2048  ;;  %p398_p1 = scmp.lt.s32.totalorder %s24_s22, %s24_s22 }
   0x6   :  { %p394_p0 = scmp.ne.s32.totalorder %s24_s22, %s393_s23  ;;  %p399_p2 = scmp.lt.s32.totalorder %s393_s23, %s393_s23 }
   0x8   :  { %p400_p3 = por %p399_p2, %p398_p1 }
   0xa   :  { %p401_p4 = pnand %p400_p3, %p394_p0 }
   0xc   :  { %404 = shalt.err (!%p401_p4)
}
   0xd   :  { %s474_s24 = smov 128   ;;  %s475_s25 = smov 8  }
   0xe   :  { %29 = dma.hbm_to_vmem [thread:$0]  %s572_s1, 2048, %s24_s22, [#allocation3], %s474_s24, %s474_s24, %s475_s25  }
   0xf   :  { %s476_s28 = smov [#allocation5]  }
  0x10   :  { %s37_s29 = sshll.u32 %s476_s28, 4  ;;  %s38_s29 = int_to_ptr.vmem [resolvable:$true] %s37_s29 }
  0x11   :  { %s413_s30 = scalar_lea.vmem %s38_s29, 2048  ;;  %p418_p6 = scmp.lt.s32.totalorder %s38_s29, %s38_s29 }
  0x12   :  { %p414_p5 = scmp.ne.s32.totalorder %s38_s29, %s413_s30  ;;  %p419_p7 = scmp.lt.s32.totalorder %s413_s30, %s413_s30 }
  0x14   :  { %p420_p8 = por %p419_p7, %p418_p6 }
  0x16   :  { %p421_p9 = pnand %p420_p8, %p414_p5 }
  0x18   :  { %424 = shalt.err (!%p421_p9)
}
  0x19   :  { %43 = dma.hbm_to_vmem [thread:$0]  %s574_s3, 2048, %s38_s29, [#allocation6], %s474_s24, %s474_s24, %s475_s25  }
  0x1a   :  { %465 = dma.done.wait [#allocation3], 2048  }
  0x1b   :  { %466 = vsyncadd [#allocation3], 4294965248 }
  0x1c   :  { %467 = dma.done.wait [#allocation6], 2048  }
  0x1d   :  { %468 = vsyncadd [#allocation6], 4294965248  ;;  %v477_v0 = vmov 0.0   ;;  %vm478_vm0 = vmmov 0   ;;  %v68_v1 = vld [vmem:[#allocation2 + $0x78] sm:$0xff]  ;;  %v67_v2 = vld [vmem:[#allocation2 + $0x70] sm:$0xff] }
  0x1e   :  { %307 = vmatprep.subr.mxu0 %v477_v0  ;;  %339 = vmatprep.mubr.msk.f32.mxu0 %vm478_vm0, %v477_v0  ;;  %v66_v3 = vld [vmem:[#allocation2 + $0x68] sm:$0xff]  ;;  %v65_v4 = vld [vmem:[#allocation2 + $0x60] sm:$0xff]  ;;  %v162_v5 = vld [vmem:[#allocation5 + $0x78] sm:$0xff]  ;;  %s479_s10 = smov [#allocation8]  }
  0x1f   :  { %342 = vmatprep.subr.mxu1 %v477_v0  ;;  %374 = vmatprep.mubr.msk.f32.mxu1 %vm478_vm0, %v477_v0  ;;  %v64_v6 = vld [vmem:[#allocation2 + $0x58] sm:$0xff]  ;;  %v161_v7 = vld [vmem:[#allocation5 + $0x70] sm:$0xff]  ;;  %v160_v8 = vld [vmem:[#allocation5 + $0x68] sm:$0xff]  ;;  %s257_s11 = sshll.u32 %s479_s10, 4  ;;  %s258_s11 = int_to_ptr.vmem [resolvable:$true] %s257_s11 }
  0x20   :  { %308 = vmatpush3.msra.mxu0 %v68_v1  ;;  %343 = vmatpush3.msra.mxu1 %v162_v5  ;;  %v63_v9 = vld [vmem:[#allocation2 + $0x50] sm:$0xff]  ;;  %v159_v10 = vld [vmem:[#allocation5 + $0x60] sm:$0xff]  ;;  %v62_v11 = vld [vmem:[#allocation2 + $0x48] sm:$0xff]  ;;  %s425_s12 = scalar_lea.vmem %s258_s11, 128  ;;  %p430_p11 = scmp.lt.s32.totalorder %s258_s11, %s258_s11 }
  0x21   :  { %309 = vmatprep.subr.mxu0 %v477_v0  ;;  %344 = vmatprep.subr.mxu1 %v477_v0  ;;  %v158_v12 = vld [vmem:[#allocation5 + $0x58] sm:$0xff]  ;;  %v61_v13 = vld [vmem:[#allocation2 + $0x40] sm:$0xff]  ;;  %v157_v14 = vld [vmem:[#allocation5 + $0x50] sm:$0xff]  ;;  %p426_p10 = scmp.ne.s32.totalorder %s258_s11, %s425_s12  ;;  %p431_p12 = scmp.lt.s32.totalorder %s425_s12, %s425_s12 }
  0x22   :  { %310 = vmatpush3.msra.mxu0 %v67_v2  ;;  %345 = vmatpush3.msra.mxu1 %v161_v7  ;;  %v60_v15 = vld [vmem:[#allocation2 + $0x38] sm:$0xff]  ;;  %v156_v16 = vld [vmem:[#allocation5 + $0x48] sm:$0xff]  ;;  %v59_v17 = vld [vmem:[#allocation2 + $0x30] sm:$0xff] }
  0x23   :  { %311 = vmatprep.subr.mxu0 %v477_v0  ;;  %346 = vmatprep.subr.mxu1 %v477_v0  ;;  %v155_v18 = vld [vmem:[#allocation5 + $0x40] sm:$0xff]  ;;  %v58_v19 = vld [vmem:[#allocation2 + $0x28] sm:$0xff]  ;;  %v154_v20 = vld [vmem:[#allocation5 + $0x38] sm:$0xff]  ;;  %p432_p13 = por %p431_p12, %p430_p11 }
  0x24   :  { %312 = vmatpush3.msra.mxu0 %v66_v3  ;;  %347 = vmatpush3.msra.mxu1 %v160_v8  ;;  %v57_v21 = vld [vmem:[#allocation2 + $0x20] sm:$0xff]  ;;  %v153_v22 = vld [vmem:[#allocation5 + $0x30] sm:$0xff]  ;;  %v56_v23 = vld [vmem:[#allocation2 + $0x18] sm:$0xff] }
  0x25   :  { %313 = vmatprep.subr.mxu0 %v477_v0  ;;  %348 = vmatprep.subr.mxu1 %v477_v0  ;;  %v152_v24 = vld [vmem:[#allocation5 + $0x28] sm:$0xff]  ;;  %v55_v25 = vld [vmem:[#allocation2 + $0x10] sm:$0xff]  ;;  %v151_v26 = vld [vmem:[#allocation5 + $0x20] sm:$0xff]  ;;  %p433_p0 = pnand %p432_p13, %p426_p10 }
  0x26   :  { %314 = vmatpush3.msra.mxu0 %v65_v4  ;;  %349 = vmatpush3.msra.mxu1 %v159_v10  ;;  %v54_v27 = vld [vmem:[#allocation2 + $0x8] sm:$0xff]  ;;  %v150_v28 = vld [vmem:[#allocation5 + $0x18] sm:$0xff]  ;;  %v53_v29 = vld [vmem:[#allocation2] sm:$0xff] }
  0x27   :  { %315 = vmatprep.subr.mxu0 %v477_v0  ;;  %350 = vmatprep.subr.mxu1 %v477_v0  ;;  %v52_v30 = vld [vmem:[%s571_s0] sm:$0xff]  ;;  %v149_v31 = vld [vmem:[#allocation5 + $0x10] sm:$0xff]  ;;  %v148_v32 = vld [vmem:[#allocation5 + $0x8] sm:$0xff] }
  0x28   :  { %316 = vmatpush3.msra.mxu0 %v64_v6  ;;  %351 = vmatpush3.msra.mxu1 %v158_v12  ;;  %v147_v33 = vld [vmem:[#allocation5] sm:$0xff] }
  0x29   :  { %317 = vmatprep.subr.mxu0 %v477_v0  ;;  %352 = vmatprep.subr.mxu1 %v477_v0  ;;  %v271_v34 = vld [vmem:[%s573_s2] ss:$0 sm:$0xff] }
  0x2a   :  { %318 = vmatpush3.msra.mxu0 %v63_v9  ;;  %353 = vmatpush3.msra.mxu1 %v157_v14 }
  0x2b   :  { %319 = vmatprep.subr.mxu0 %v477_v0  ;;  %354 = vmatprep.subr.mxu1 %v477_v0 }
  0x2c   :  { %320 = vmatpush3.msra.mxu0 %v62_v11  ;;  %355 = vmatpush3.msra.mxu1 %v156_v16 }
  0x2d   :  { %321 = vmatprep.subr.mxu0 %v477_v0  ;;  %356 = vmatprep.subr.mxu1 %v477_v0 }
  0x2e   :  { %322 = vmatpush3.msra.mxu0 %v61_v13  ;;  %357 = vmatpush3.msra.mxu1 %v155_v18 }
  0x2f   :  { %323 = vmatprep.subr.mxu0 %v477_v0  ;;  %358 = vmatprep.subr.mxu1 %v477_v0 }
  0x30   :  { %324 = vmatpush3.msra.mxu0 %v60_v15  ;;  %359 = vmatpush3.msra.mxu1 %v154_v20 }
  0x31   :  { %325 = vmatprep.subr.mxu0 %v477_v0  ;;  %360 = vmatprep.subr.mxu1 %v477_v0 }
  0x32   :  { %326 = vmatpush3.msra.mxu0 %v59_v17  ;;  %361 = vmatpush3.msra.mxu1 %v153_v22 }
  0x33   :  { %327 = vmatprep.subr.mxu0 %v477_v0  ;;  %362 = vmatprep.subr.mxu1 %v477_v0 }
  0x34   :  { %328 = vmatpush3.msra.mxu0 %v58_v19  ;;  %363 = vmatpush3.msra.mxu1 %v152_v24 }
  0x35   :  { %329 = vmatprep.subr.mxu0 %v477_v0  ;;  %364 = vmatprep.subr.mxu1 %v477_v0 }
  0x36   :  { %330 = vmatpush3.msra.mxu0 %v57_v21  ;;  %365 = vmatpush3.msra.mxu1 %v151_v26 }
  0x37   :  { %331 = vmatprep.subr.mxu0 %v477_v0  ;;  %366 = vmatprep.subr.mxu1 %v477_v0 }
  0x38   :  { %332 = vmatpush3.msra.mxu0 %v56_v23  ;;  %367 = vmatpush3.msra.mxu1 %v150_v28 }
  0x39   :  { %333 = vmatprep.subr.mxu0 %v477_v0  ;;  %368 = vmatprep.subr.mxu1 %v477_v0 }
  0x3a   :  { %334 = vmatpush3.msra.mxu0 %v55_v25  ;;  %369 = vmatpush3.msra.mxu1 %v149_v31 }
  0x3b   :  { %335 = vmatprep.subr.mxu0 %v477_v0  ;;  %370 = vmatprep.subr.mxu1 %v477_v0 }
  0x3c   :  { %336 = vmatpush3.msra.mxu0 %v54_v27  ;;  %371 = vmatpush3.msra.mxu1 %v148_v32 }
  0x3d   :  { %337 = vmatprep.subr.mxu0 %v477_v0  ;;  %372 = vmatprep.subr.mxu1 %v477_v0 }
  0x3e   :  { %338 = vmatpush3.msra.mxu0 %v53_v29  ;;  %373 = vmatpush3.msra.mxu1 %v147_v33 }
  0x3f   :  { %340 = vmatmul.mubr.f32.vlgmr.msra.gmra.mxu0 %v52_v30 }
  0xff   :  { %v142_v35 = vpop.f32.mrf.mxu0 }
 0x100   :  { %v143_v36 = vadd.f32 %v271_v34, %v142_v35 }
 0x101   :  { %v341_v37 = vpop.f32.mrf.mxu0 }
 0x102   :  { %146 = vst [vmem:[#allocation8] sm:$0xff] %v143_v36  ;;  %375 = vmatmul.mubr.f32.vlgmr.msra.gmra.mxu1 %v143_v36 }
 0x103   :  { %436 = shalt.err (!%p433_p0)
}
 0x104   :  { %260 = dma.vmem_to_hbm [thread:$0]  %s258_s11, 128, %s577_s6, [#allocation9]   ;;  %v272_v38 = vld [vmem:[%s575_s4] ss:$0 sm:$0xff] }
 0x105   :  { %s480_s16 = smov [#allocation7]  }
 0x106   :  { %s247_s17 = sshll.u32 %s480_s16, 4  ;;  %s248_s17 = int_to_ptr.vmem [resolvable:$true] %s247_s17 }
 0x107   :  { %s445_s18 = scalar_lea.vmem %s248_s17, 128  ;;  %p450_p2 = scmp.lt.s32.totalorder %s248_s17, %s248_s17 }
 0x108   :  { %p446_p1 = scmp.ne.s32.totalorder %s248_s17, %s445_s18  ;;  %p451_p3 = scmp.lt.s32.totalorder %s445_s18, %s445_s18 }
 0x10a   :  { %p452_p4 = por %p451_p3, %p450_p2 }
 0x10c   :  { %p453_p5 = pnand %p452_p4, %p446_p1 }
 0x1c2   :  { %v236_v39 = vpop.f32.mrf.mxu1 }
 0x1c3   :  { %v237_v40 = vadd.f32 %v272_v38, %v236_v39 }
 0x1c4   :  { %v376_v41 = vpop.f32.mrf.mxu1 }
 0x1c5   :  { %240 = vst [vmem:[#allocation7] sm:$0xff] %v237_v40 }
 0x1c6   :  { %456 = shalt.err (!%p453_p5)
}
 0x1c7   :  { %250 = dma.vmem_to_hbm [thread:$0]  %s248_s17, 128, %s576_s5, [#allocation4]  }
 0x1c8   :  { %469 = dma.done.wait [#allocation4], 128  }
 0x1c9   :  { %470 = vsyncadd [#allocation4], 4294967168 }
 0x1ca   :  { %471 = dma.done.wait [#allocation9], 128  }
 0x1cb   :  { %472 = vsyncadd [#allocation9], 4294967168 }
 0x1cc   :  { %267 = vsyncpa [#allocation3], 1 }
 0x1cd   :  { %268 = vsyncpa [#allocation6], 1 }
 0x1ce   :  { %269 = vsyncpa [#allocation4], 1 }
 0x1cf   :  { %270 = vsyncpa [#allocation9], 1 }

</bundles_post_ra>
